<compile_context>
chip_gen: v7x
topology: tpu7x:2x2x1
jax: 0.10.0
libtpu: 0.0.40
codegen_flags: <defaults>
</compile_context>

<pallas_src>
import jax
import jax.numpy as jnp
from jax.experimental import pallas as pl
from jax.experimental.pallas import tpu as pltpu


# ----------------------------------------------------------------------------
# Pallas kernels
# ----------------------------------------------------------------------------
def gnn_layer_kernel(L_ref, gk_ref, gi_ref, w_ref, b_ref, out_ref, acc_ref):
    """One GNNLayer forward (+ the ReLU applied right after it in GCF.forward).

    g = [f | f*f]  (bf16).  Grid = (row tiles, K tiles of the Laplacian).
    acc accumulates the (TM, 2*inF) block of L @ g in f32; on the last K step the
    fused projection h @ W + b (h = [L@f | L@(f*f) | f | f*f], K = 4*inF) and the
    ReLU are applied and stored.
    """
    k = pl.program_id(1)

    @pl.when(k == 0)
    def _():
        acc_ref[...] = jnp.zeros_like(acc_ref)

    # bf16 x bf16 -> f32 accumulate on the MXU.
    acc_ref[...] += jnp.dot(L_ref[...], gk_ref[...],
                            preferred_element_type=jnp.float32)

    @pl.when(k == pl.num_programs(1) - 1)
    def _():
        # h = [L@f | L@(f*f) | f | f*f]  -> one K = 4*inF projection matmul.
        h = jnp.concatenate([acc_ref[...], gi_ref[...].astype(jnp.float32)],
                            axis=-1)
        proj = jnp.dot(h, w_ref[...], preferred_element_type=jnp.float32)
        out_ref[...] = jnp.maximum(proj + b_ref[...], 0.0)


def pred_mlp_kernel(embd_ref, w1_ref, b1_ref, w2_ref, b2_ref, w3r_ref, b3_ref,
                    out_ref):
    """embd -> ReLU(transForm1) -> transForm2 -> transForm3 (last layer on VPU)."""
    x = embd_ref[...]
    h = jnp.dot(x, w1_ref[...], preferred_element_type=jnp.float32) + b1_ref[...]
    h = jnp.maximum(h, 0.0)
    h = jnp.dot(h, w2_ref[...], preferred_element_type=jnp.float32) + b2_ref[...]
    # Final (TB,32)@(32,1) as a lane-wise reduction instead of a 1-lane MXU matmul.
    out_ref[...] = jnp.sum(h * w3r_ref[...], axis=-1, keepdims=True) + b3_ref[...]


# ----------------------------------------------------------------------------
# pallas_call wrappers
# ----------------------------------------------------------------------------
def _pick_tile(n, candidates=(512, 256, 128)):
    """Largest candidate tile that divides n; else the full dimension."""
    for t in candidates:
        if n >= t and n % t == 0:
            return t
    return n


def gnn_layer(L_bf16, g_bf16, w_fused, b_fused):
    """features_out = ReLU(GNNLayer(L, I, g))  with g = [f | f*f] in bf16."""
    N = L_bf16.shape[0]
    two_inF = g_bf16.shape[1]
    out_f = w_fused.shape[1]

    TM = _pick_tile(N)   # row tile   (parallel; sized for v7x's 64 MiB VMEM)
    TK = _pick_tile(N)   # reduction tile (arbitrary, last grid axis)
    grid = (N // TM, N // TK)

    flops = 2 * N * N * two_inF + 2 * N * (2 * two_inF) * out_f
    bytes_accessed = (N * N * 2                      # L (bf16)
                      + 2 * N * two_inF * 2          # g streamed twice (bf16)
                      + 2 * two_inF * out_f * 4      # fused W
                      + N * out_f * 4)               # output

    return pl.pallas_call(
        gnn_layer_kernel,
        out_shape=jax.ShapeDtypeStruct((N, out_f), jnp.float32),
        grid_spec=pltpu.PrefetchScalarGridSpec(
            num_scalar_prefetch=0,
            grid=grid,
            in_specs=[
                pl.BlockSpec((TM, TK), lambda i, k: (i, k)),          # L tile
                pl.BlockSpec((TK, two_inF), lambda i, k: (k, 0)),     # g along K
                pl.BlockSpec((TM, two_inF), lambda i, k: (i, 0)),     # g at rows i
                pl.BlockSpec((2 * two_inF, out_f), lambda i, k: (0, 0)),  # fused W
                pl.BlockSpec((1, out_f), lambda i, k: (0, 0)),            # fused b
            ],
            out_specs=pl.BlockSpec((TM, out_f), lambda i, k: (i, 0)),
            scratch_shapes=[pltpu.VMEM((TM, two_inF), jnp.float32)],
        ),
        compiler_params=pltpu.CompilerParams(
            dimension_semantics=("parallel", "arbitrary"),
            vmem_limit_bytes=32 * 1024 * 1024,
        ),
        cost_estimate=pl.CostEstimate(
            flops=flops, transcendentals=0, bytes_accessed=bytes_accessed),
    )(L_bf16, g_bf16, g_bf16, w_fused, b_fused)


def pred_mlp(embd, w1, b1, w2, b2, w3_row, b3):
    B, D_in = embd.shape
    h1 = w1.shape[1]
    h2 = w2.shape[1]
    TB = 256 if (B > 256 and B % 256 == 0) else B
    grid = (B // TB,)

    flops = 2 * B * D_in * h1 + 2 * B * h1 * h2 + 2 * B * h2
    bytes_accessed = (B * D_in * 4 + D_in * h1 * 4 + h1 * h2 * 4
                      + h2 * 4 + B * 4)

    return pl.pallas_call(
        pred_mlp_kernel,
        out_shape=jax.ShapeDtypeStruct((B, 1), jnp.float32),
        grid_spec=pltpu.PrefetchScalarGridSpec(
            num_scalar_prefetch=0,
            grid=grid,
            in_specs=[
                pl.BlockSpec((TB, D_in), lambda b: (b, 0)),
                pl.BlockSpec((D_in, h1), lambda b: (0, 0)),
                pl.BlockSpec((1, h1), lambda b: (0, 0)),
                pl.BlockSpec((h1, h2), lambda b: (0, 0)),
                pl.BlockSpec((1, h2), lambda b: (0, 0)),
                pl.BlockSpec((1, h2), lambda b: (0, 0)),
                pl.BlockSpec((1, 1), lambda b: (0, 0)),
            ],
            out_specs=pl.BlockSpec((TB, 1), lambda b: (b, 0)),
        ),
        compiler_params=pltpu.CompilerParams(
            dimension_semantics=("parallel",),
            vmem_limit_bytes=32 * 1024 * 1024,
        ),
        cost_estimate=pl.CostEstimate(
            flops=flops, transcendentals=0, bytes_accessed=bytes_accessed),
    )(embd, w1, b1, w2, b2, w3_row, b3)


# ----------------------------------------------------------------------------
# Parameter construction (deterministic, mirrors GCF.__init__ shapes)
# ----------------------------------------------------------------------------
def _linear_params(key, in_f, out_f):
    kw, kb = jax.random.split(key)
    bound = 1.0 / (in_f ** 0.5)
    w = jax.random.uniform(kw, (in_f, out_f), jnp.float32, -bound, bound)
    b = jax.random.uniform(kb, (1, out_f), jnp.float32, -bound, bound)
    return w, b


def build_laplacian(key, user_num, item_num):
    """Dense equivalent of the D^-1/2 (A + I) D^-1/2 part of syn_buildLaplacianMat.

    With uuflg=iiflg=False the UI-Laplacian is exactly the identity, so it is
    dropped entirely (its two matmuls are folded into the fused projection).
    Returned in bf16: the Laplacian matmul is HBM/MXU bound and bf16 halves both.
    """
    n = user_num + item_num
    # synthetic ratings matrix R (userNum, itemNum), values in [1, 5]
    R = jax.random.uniform(key, (user_num, item_num), jnp.float32, 1.0, 5.0)
    A0 = jnp.zeros((n, n), jnp.float32)
    A0 = A0.at[:user_num, user_num:].set(R)
    A0 = A0.at[user_num:, :user_num].set(R.T)
    A0 = A0 + jnp.eye(n, dtype=jnp.float32)                  # + selfLoop
    d = jnp.power(jnp.sum(A0, axis=1), -0.5)
    L = (A0 * d[:, None]) * d[None, :]                       # D^-1/2 A D^-1/2
    # TODO(synk): for real (sparse) rating matrices, skip all-zero (TM,TK) tiles of L
    # via PrefetchScalarGridSpec block offsets instead of streaming the dense matrix.
    return L.astype(jnp.bfloat16)


def _fuse_gnn_layer(wl, bl, wl1, bl1, wa, ba, wa1, ba1):
    """Stack the four projections into one K = 4*inF matmul, pre-sum the biases."""
    # h = [L@f | L@(f*f) | f | f*f]  ->  rows ordered (linear, interAct, linear1, interAct1)
    W = jnp.concatenate([wl, wa, wl1, wa1], axis=0)          # (4*inF, outF)
    b = bl + ba + bl1 + ba1                                   # (1, outF)
    return W, b


def init_gcf_params(key, user_num, item_num, embed_size=64, layers=(64, 64)):
    keys = jax.random.split(key, 16)
    params = {
        "uEmbd": jax.random.normal(keys[0], (user_num, embed_size), jnp.float32),
        "iEmbd": jax.random.normal(keys[1], (item_num, embed_size), jnp.float32),
        "L": build_laplacian(keys[2], user_num, item_num),
    }

    raw_layers, fused_layers = [], []
    ki = 3
    for in_f, out_f in zip(layers[:-1], layers[1:]):
        wl, bl = _linear_params(keys[ki], in_f, out_f)        # linear
        wl1, bl1 = _linear_params(keys[ki + 1], in_f, out_f)  # linear1
        wa, ba = _linear_params(keys[ki + 2], in_f, out_f)    # interActTransform
        wa1, ba1 = _linear_params(keys[ki + 3], in_f, out_f)  # interActTransform1
        ki += 4
        # NOTE: coefficient1..4 exist in GNNLayer.__init__ but are unused in forward.
        raw_layers.append((wl, bl, wl1, bl1, wa, ba, wa1, ba1))
        fused_layers.append(_fuse_gnn_layer(wl, bl, wl1, bl1, wa, ba, wa1, ba1))
    params["gnn_layers_raw"] = raw_layers
    params["gnn_layers_fused"] = fused_layers

    cat_dim = layers[-1] * len(layers) * 2
    params["transForm1"] = _linear_params(keys[ki], cat_dim, 64)
    params["transForm2"] = _linear_params(keys[ki + 1], 64, 32)
    params["transForm3"] = _linear_params(keys[ki + 2], 32, 1)
    # TODO(synk): transFormcat / leakyRelu are defined in GCF.__init__ but never used
    # in forward; the uuflg/iiflg=True cosine-top-k graph branches are host-side glue.
    return params


# ----------------------------------------------------------------------------
# GCF forward (Pallas path) and a pure-JAX reference for verification
# ----------------------------------------------------------------------------
def gcf_forward(params, user_idx, item_idx, user_num):
    features = jnp.concatenate([params["uEmbd"], params["iEmbd"]], axis=0)  # (N, E)
    final_embd = features
    L_bf16 = params["L"]
    for w_fused, b_fused in params["gnn_layers_fused"]:
        g = jnp.concatenate([features, features * features],
                            axis=1).astype(jnp.bfloat16)      # (N, 2*inF), lane-dense
        features = gnn_layer(L_bf16, g, w_fused, b_fused)
        final_embd = jnp.concatenate([final_embd, features], axis=1)

    user_embd = final_embd[user_idx]                          # gather: plain-JAX glue
    item_embd = final_embd[item_idx + user_num]
    embd = jnp.concatenate([user_embd, item_embd], axis=1)

    w1, b1 = params["transForm1"]
    w2, b2 = params["transForm2"]
    w3, b3 = params["transForm3"]
    pred = pred_mlp(embd, w1, b1, w2, b2, w3.T, b3).reshape(-1)
    return pred, user_embd, item_embd, final_embd


def gcf_forward_ref(params, user_idx, item_idx, user_num):
    """Plain-JAX reference with the original (unfused) per-Linear structure, L3 = I."""
    features = jnp.concatenate([params["uEmbd"], params["iEmbd"]], axis=0)
    L = params["L"].astype(jnp.float32)
    final_embd = features
    for wl, bl, wl1, bl1, wa, ba, wa1, ba1 in params["gnn_layers_raw"]:
        inF = features.shape[1]
        g = jnp.concatenate([features, features * features],
                            axis=1).astype(jnp.bfloat16).astype(jnp.float32)
        f, inter = g[:, :inF], g[:, inF:]
        Lf, Li = L @ f, L @ inter
        out = (Lf @ wl + bl) + (f @ wl1 + bl1) + (Li @ wa + ba) + (inter @ wa1 + ba1)
        features = jnp.maximum(out, 0.0)
        final_embd = jnp.concatenate([final_embd, features], axis=1)

    user_embd = final_embd[user_idx]
    item_embd = final_embd[item_idx + user_num]
    embd = jnp.concatenate([user_embd, item_embd], axis=1)
    w1, b1 = params["transForm1"]
    w2, b2 = params["transForm2"]
    w3, b3 = params["transForm3"]
    h = jnp.maximum(embd @ w1 + b1, 0.0)
    h = h @ w2 + b2
    pred = (h @ w3 + b3).reshape(-1)
    return pred, user_embd, item_embd, final_embd


# ----------------------------------------------------------------------------
if __name__ == "__main__":
    user_num, item_num = 8, 8
    embed_size = 64
    layers = (64, 64)
    batch = 8

    key = jax.random.PRNGKey(0)
    kp, ku, ki = jax.random.split(key, 3)

    params = init_gcf_params(kp, user_num, item_num, embed_size, layers)
    user_idx = jax.random.randint(ku, (batch,), 0, user_num)
    item_idx = jax.random.randint(ki, (batch,), 0, item_num)

    pred, user_embd, item_embd, final_embd = gcf_forward(
        params, user_idx, item_idx, user_num)
    jax.block_until_ready((pred, user_embd, item_embd, final_embd))

    assert pred.shape == (batch,)
    assert user_embd.shape == (batch, embed_size * len(layers))
    assert item_embd.shape == (batch, embed_size * len(layers))
    assert final_embd.shape == (user_num + item_num, embed_size * len(layers))

    # Loose numerical check against the pure-JAX reference (bf16 MXU inputs).
    pred_r, _, _, final_r = gcf_forward_ref(params, user_idx, item_idx, user_num)
    assert jnp.allclose(final_embd, final_r, atol=1e-1, rtol=1e-1)
    assert jnp.allclose(pred, pred_r, atol=1e-1, rtol=1e-1)

    print("KERNEL_OK")
</pallas_src>

<mosaic_0001>
module attributes {stable_mosaic.version = 11 : i64} {
  func.func @gnn_layer_kernel(%arg0: i32, %arg1: i32, %arg2: memref<16x16xbf16, #tpu.memory_space<vmem>>, %arg3: memref<16x128xbf16, #tpu.memory_space<vmem>>, %arg4: memref<16x128xbf16, #tpu.memory_space<vmem>>, %arg5: memref<256x64xf32, #tpu.memory_space<vmem>>, %arg6: memref<1x64xf32, #tpu.memory_space<vmem>>, %arg7: memref<16x64xf32, #tpu.memory_space<vmem>>, %arg8: memref<16x128xf32, #tpu.memory_space<vmem>>) attributes {dimension_semantics = [#tpu.dimension_semantics<parallel>, #tpu.dimension_semantics<arbitrary>], iteration_bounds = array<i64: 1, 1>, scalar_prefetch = 0 : i64, scratch_operands = 1 : i64, tpu.core_type = #tpu.core_type<tc>, window_params = [{transform_indices = @transform_0, window_bounds = array<i64: 16, 16>}, {transform_indices = @transform_1, window_bounds = array<i64: 16, 128>}, {transform_indices = @transform_2, window_bounds = array<i64: 16, 128>}, {pipeline_mode = #tpu.pipeline_mode<synchronous>, transform_indices = @transform_3, window_bounds = array<i64: 256, 64>}, {pipeline_mode = #tpu.pipeline_mode<synchronous>, transform_indices = @transform_4, window_bounds = array<i64: 1, 64>}, {transform_indices = @transform_5, window_bounds = array<i64: 16, 64>}]} {
    %c0_i32 = arith.constant 0 : i32
    %0 = arith.cmpi eq, %arg1, %c0_i32 : i32
    %1 = arith.extui %0 : i1 to i32
    %c0_i32_0 = arith.constant 0 : i32
    %2 = arith.cmpi ne, %1, %c0_i32_0 : i32
    scf.if %2 {
      %cst_10 = arith.constant 0.000000e+00 : f32
      %12 = vector.broadcast %cst_10 : f32 to vector<16x128xf32>
      %c0_11 = arith.constant 0 : index
      %c0_12 = arith.constant 0 : index
      %13 = vector.load %arg8[%c0_11, %c0_12] : memref<16x128xf32, #tpu.memory_space<vmem>>, vector<16x128xf32>
      tpu.vector_store %arg8[%c0_11, %c0_12], %12 {strides = array<i32>} : memref<16x128xf32, #tpu.memory_space<vmem>>, vector<16x128xf32>,
    } else {
    }
    %c0 = arith.constant 0 : index
    %c0_1 = arith.constant 0 : index
    %3 = vector.load %arg8[%c0, %c0_1] : memref<16x128xf32, #tpu.memory_space<vmem>>, vector<16x128xf32>
    %c0_2 = arith.constant 0 : index
    %c0_3 = arith.constant 0 : index
    %4 = vector.load %arg2[%c0_2, %c0_3] : memref<16x16xbf16, #tpu.memory_space<vmem>>, vector<16x16xbf16>
    %c0_4 = arith.constant 0 : index
    %c0_5 = arith.constant 0 : index
    %5 = vector.load %arg3[%c0_4, %c0_5] : memref<16x128xbf16, #tpu.memory_space<vmem>>, vector<16x128xbf16>
    %cst = arith.constant dense<0.000000e+00> : vector<16x128xf32>
    %6 = tpu.matmul %4, %5, %cst {dimension_numbers = #tpu.dot_dimension_numbers<[1], [0], [0], [1], [0, 0, 1, 1], [], []>} : vector<16x16xbf16>, vector<16x128xbf16>, vector<16x128xf32> -> vector<16x128xf32>
    %7 = arith.addf %3, %6 : vector<16x128xf32>
    %c0_6 = arith.constant 0 : index
    %c0_7 = arith.constant 0 : index
    %8 = vector.load %arg8[%c0_6, %c0_7] : memref<16x128xf32, #tpu.memory_space<vmem>>, vector<16x128xf32>
    tpu.vector_store %arg8[%c0_6, %c0_7], %7 {strides = array<i32>} : memref<16x128xf32, #tpu.memory_space<vmem>>, vector<16x128xf32>,
    %c0_i32_8 = arith.constant 0 : i32
    %9 = arith.cmpi eq, %arg1, %c0_i32_8 : i32
    %10 = arith.extui %9 : i1 to i32
    %c0_i32_9 = arith.constant 0 : i32
    %11 = arith.cmpi ne, %10, %c0_i32_9 : i32
    scf.if %11 {
      %c0_10 = arith.constant 0 : index
      %c0_11 = arith.constant 0 : index
      %12 = vector.load %arg8[%c0_10, %c0_11] : memref<16x128xf32, #tpu.memory_space<vmem>>, vector<16x128xf32>
      %c0_12 = arith.constant 0 : index
      %c0_13 = arith.constant 0 : index
      %13 = vector.load %arg4[%c0_12, %c0_13] : memref<16x128xbf16, #tpu.memory_space<vmem>>, vector<16x128xbf16>
      %14 = arith.extf %13 : vector<16x128xbf16> to vector<16x128xf32>
      %15 = tpu.concatenate %12, %14 in 1 : vector<16x128xf32>, vector<16x128xf32> -> vector<16x256xf32>
      %c0_14 = arith.constant 0 : index
      %c0_15 = arith.constant 0 : index
      %16 = vector.load %arg5[%c0_14, %c0_15] : memref<256x64xf32, #tpu.memory_space<vmem>>, vector<256x64xf32>
      %cst_16 = arith.constant dense<0.000000e+00> : vector<16x64xf32>
      %17 = tpu.matmul %15, %16, %cst_16 {dimension_numbers = #tpu.dot_dimension_numbers<[1], [0], [0], [1], [0, 0, 1, 1], [], []>} : vector<16x256xf32>, vector<256x64xf32>, vector<16x64xf32> -> vector<16x64xf32>
      %c0_17 = arith.constant 0 : index
      %c0_18 = arith.constant 0 : index
      %18 = vector.load %arg6[%c0_17, %c0_18] : memref<1x64xf32, #tpu.memory_space<vmem>>, vector<1x64xf32>
      %19 = vector.broadcast %18 : vector<1x64xf32> to vector<16x64xf32>
      %20 = arith.addf %17, %19 : vector<16x64xf32>
      %cst_19 = arith.constant 0.000000e+00 : f32
      %21 = vector.broadcast %cst_19 : f32 to vector<16x64xf32>
      %22 = arith.maximumf %20, %21 : vector<16x64xf32>
      %c0_20 = arith.constant 0 : index
      %c0_21 = arith.constant 0 : index
      %23 = vector.load %arg7[%c0_20, %c0_21] : memref<16x64xf32, #tpu.memory_space<vmem>>, vector<16x64xf32>
      tpu.vector_store %arg7[%c0_20, %c0_21], %22 {strides = array<i32>} : memref<16x64xf32, #tpu.memory_space<vmem>>, vector<16x64xf32>,
    } else {
    }
    return
  }
  func.func @transform_0(%arg0: i32, %arg1: i32) -> (i32, i32) {
    %c0_i32 = arith.constant 0 : i32
    return %arg0, %arg1 : i32, i32
  }
  func.func @transform_1(%arg0: i32, %arg1: i32) -> (i32, i32) {
    %c0_i32 = arith.constant 0 : i32
    %c0_i32_0 = arith.constant 0 : i32
    return %arg1, %c0_i32 : i32, i32
  }
  func.func @transform_2(%arg0: i32, %arg1: i32) -> (i32, i32) {
    %c0_i32 = arith.constant 0 : i32
    %c0_i32_0 = arith.constant 0 : i32
    return %arg0, %c0_i32 : i32, i32
  }
  func.func @transform_3(%arg0: i32, %arg1: i32) -> (i32, i32) {
    %c0_i32 = arith.constant 0 : i32
    %c0_i32_0 = arith.constant 0 : i32
    %c0_i32_1 = arith.constant 0 : i32
    return %c0_i32, %c0_i32_0 : i32, i32
  }
  func.func @transform_4(%arg0: i32, %arg1: i32) -> (i32, i32) {
    %c0_i32 = arith.constant 0 : i32
    %c0_i32_0 = arith.constant 0 : i32
    %c0_i32_1 = arith.constant 0 : i32
    return %c0_i32, %c0_i32_0 : i32, i32
  }
  func.func @transform_5(%arg0: i32, %arg1: i32) -> (i32, i32) {
    %c0_i32 = arith.constant 0 : i32
    %c0_i32_0 = arith.constant 0 : i32
    return %arg0, %c0_i32 : i32, i32
  }
}

</mosaic_0001>

<bundles_post_ra>
// kernel: tpu_custom_call.1
= control target key start
LH: loop header
LB: loop body
LE: loop exit
PB: predicated region body
PF: predicated region fallthrough
CT: control target
= control target key end

     0   :  { %v355_v1 = vmov 0.0   ;;  %vm356_vm0 = vmmov 0   ;;  %vm45_vm1 = vcmask 130048   ;;  %s510_s0 = inlined_call_operand.vmem [shape: bf16[16,16], index: 0, kind: input, shape index: {}]   ;;  %s511_s1 = inlined_call_operand.vmem [shape: bf16[16,128], index: 1, kind: input, shape index: {}]   ;;  %s512_s2 = inlined_call_operand.vmem [shape: bf16[16,128], index: 2, kind: input, shape index: {}]   ;;  %s513_s3 = inlined_call_operand.vmem [shape: f32[256,64], index: 3, kind: input, shape index: {}]   ;;  %s514_s4 = inlined_call_operand.vmem [shape: f32[1,64], index: 4, kind: input, shape index: {}]   ;;  %s515_s5 = inlined_call_operand.hbm [shape: f32[16,64], index: 5, kind: output, shape index: {}]  }
   0x1   :  { %v329_v0 = vld [vmem:[%s511_s1] sm:$0xff]   ;;  %286 = vmatprep.subr.bf16.mxu0 %v355_v1  ;;  %288 = vmatprep.mubr.msk.bf16.mxu0 %vm356_vm0, %v355_v1  ;;  %v120_v4 = vld [vmem:[%s513_s3 + $0x88] sm:$0xff]  ;;  %v121_v8 = vld [vmem:[%s513_s3 + $0x90] sm:$0xff] }
   0x2   :  { %v330_v2 = vld [vmem:[%s510_s0] sm:$0xff]   ;;  %287 = vmatpush3.bf16.msra.mxu0 %v329_v0  ;;  %v104_v7 = vld [vmem:[%s513_s3 + $0x8] sm:$0xff]  ;;  %v122_v9 = vld [vmem:[%s513_s3 + $0x98] sm:$0xff] }
   0x3   :  { %v119_v3 = vld [vmem:[%s513_s3 + $0x80] sm:$0xff]  ;;  %v296_v11 = vpack.c.bf16 %v122_v9, %v121_v8  ;;  %v105_v12 = vld [vmem:[%s513_s3 + $0x10] sm:$0xff]  ;;  %v106_v13 = vld [vmem:[%s513_s3 + $0x18] sm:$0xff] }
   0x4   :  { %v103_v5 = vld [vmem:[%s513_s3] sm:$0xff]  ;;  %v292_v6 = vpack.c.bf16 %v120_v4, %v119_v3  ;;  %v124_v15 = vld [vmem:[%s513_s3 + $0xa8] sm:$0xff]  ;;  %v298_v16 = vpack.c.bf16 %v106_v13, %v105_v12  ;;  %v125_v20 = vld [vmem:[%s513_s3 + $0xb0] sm:$0xff] }
   0x5   :  { %v294_v10 = vpack.c.bf16 %v104_v7, %v103_v5  ;;  %v123_v14 = vld [vmem:[%s513_s3 + $0xa0] sm:$0xff]  ;;  %289 = vmatmul.mubr.msk.bf16.vlgmr.msra.gmra.mrb[0].mxu0 %vm45_vm1, %v330_v2  ;;  %v108_v19 = vld [vmem:[%s513_s3 + $0x28] sm:$0xff]  ;;  %v126_v21 = vld [vmem:[%s513_s3 + $0xb8] sm:$0xff] }
   0x6   :  { %293 = vmatprep.subr.bf16.mxu1 %v292_v6  ;;  %v300_v17 = vpack.c.bf16 %v124_v15, %v123_v14  ;;  %v107_v18 = vld [vmem:[%s513_s3 + $0x20] sm:$0xff]  ;;  %v304_v23 = vpack.c.bf16 %v126_v21, %v125_v20  ;;  %v109_v24 = vld [vmem:[%s513_s3 + $0x30] sm:$0xff]  ;;  %v110_v25 = vld [vmem:[%s513_s3 + $0x38] sm:$0xff] }
   0x7   :  { %295 = vmatpush3.bf16.msra.mxu1 %v294_v10  ;;  %v302_v22 = vpack.c.bf16 %v108_v19, %v107_v18  ;;  %v127_v26 = vld [vmem:[%s513_s3 + $0xc0] sm:$0xff]  ;;  %v128_v27 = vld [vmem:[%s513_s3 + $0xc8] sm:$0xff] }
   0x8   :  { %297 = vmatprep.subr.bf16.mxu1 %v296_v11 }
   0xb   :  { %299 = vmatpush3.bf16.msra.mxu1 %v298_v16 }
   0xc   :  { %301 = vmatprep.subr.bf16.mxu1 %v300_v17 }
   0xd   :  { %10 = vsyncpa [#allocation4], 0  ;;  %v306_v28 = vpack.c.bf16 %v110_v25, %v109_v24  ;;  %v308_v29 = vpack.c.bf16 %v128_v27, %v127_v26  ;;  %v111_v30 = vld [vmem:[%s513_s3 + $0x40] sm:$0xff]  ;;  %v112_v31 = vld [vmem:[%s513_s3 + $0x48] sm:$0xff]  ;;  %vm219_vm2 = vcmask 523264  }
   0xe   :  { %v129_v32 = vld [vmem:[%s513_s3 + $0xd0] sm:$0xff]  ;;  %v130_v33 = vld [vmem:[%s513_s3 + $0xd8] sm:$0xff]  ;;  %v310_v34 = vpack.c.bf16 %v112_v31, %v111_v30  ;;  %v131_v38 = vld [vmem:[%s513_s3 + $0xe0] sm:$0xff] }
   0xf   :  { %303 = vmatpush3.bf16.msra.mxu1 %v302_v22  ;;  %v312_v35 = vpack.c.bf16 %v130_v33, %v129_v32  ;;  %v113_v36 = vld [vmem:[%s513_s3 + $0x50] sm:$0xff]  ;;  %v114_v37 = vld [vmem:[%s513_s3 + $0x58] sm:$0xff]  ;;  %v132_v39 = vld [vmem:[%s513_s3 + $0xe8] sm:$0xff] }
  0x10   :  { %305 = vmatprep.subr.bf16.mxu1 %v304_v23  ;;  %v314_v40 = vpack.c.bf16 %v114_v37, %v113_v36  ;;  %v316_v41 = vpack.c.bf16 %v132_v39, %v131_v38  ;;  %v115_v42 = vld [vmem:[%s513_s3 + $0x60] sm:$0xff]  ;;  %v116_v43 = vld [vmem:[%s513_s3 + $0x68] sm:$0xff]  ;;  %v133_v44 = vld [vmem:[%s513_s3 + $0xf0] sm:$0xff] }
  0x11   :  { %v134_v45 = vld [vmem:[%s513_s3 + $0xf8] sm:$0xff]  ;;  %v318_v46 = vpack.c.bf16 %v116_v43, %v115_v42  ;;  %v117_v48 = vld [vmem:[%s513_s3 + $0x70] sm:$0xff]  ;;  %v243_v51 = vld [vmem:[%s512_s2] sm:$0xff]   ;;  %s357_s2 = smov [#allocation3]  }
  0x12   :  { %v320_v47 = vpack.c.bf16 %v134_v45, %v133_v44  ;;  %v118_v49 = vld [vmem:[%s513_s3 + $0x78] sm:$0xff]  ;;  %v244_v52 = vunpack.c.l.bf16 %v243_v51  ;;  %v245_v53 = vunpack.c.h.bf16 %v243_v51  ;;  %v241_v59 = vld [vmem:[%s514_s4] ss:$0 sm:$0xff]  ;;  %s227_s8 = sshll.u32 %s357_s2, 4  ;;  %s228_s8 = int_to_ptr.vmem [resolvable:$true] %s227_s8 }
  0x13   :  { %307 = vmatpush3.bf16.msra.mxu1 %v306_v28  ;;  %v322_v50 = vpack.c.bf16 %v118_v49, %v117_v48  ;;  %s331_s9 = scalar_lea.vmem %s228_s8, 256  ;;  %p336_p1 = scmp.lt.s32.totalorder %s228_s8, %s228_s8 }
  0x14   :  { %309 = vmatprep.subr.bf16.mxu1 %v308_v29  ;;  %206 = vmatprep.mubr.f32.mxu1 %v244_v52  ;;  %p332_p0 = scmp.ne.s32.totalorder %s228_s8, %s331_s9  ;;  %p337_p2 = scmp.lt.s32.totalorder %s331_s9, %s331_s9 }
  0x16   :  { %p338_p3 = por %p337_p2, %p336_p1 }
  0x17   :  { %311 = vmatpush3.bf16.msra.mxu1 %v310_v34 }
  0x18   :  { %313 = vmatprep.subr.bf16.mxu1 %v312_v35  ;;  %p339_p4 = pnand %p338_p3, %p332_p0 }
  0x1b   :  { %315 = vmatpush3.bf16.msra.mxu1 %v314_v40 }
  0x1c   :  { %317 = vmatprep.subr.bf16.mxu1 %v316_v41 }
  0x1f   :  { %319 = vmatpush3.bf16.msra.mxu1 %v318_v46 }
  0x20   :  { %321 = vmatprep.subr.bf16.mxu1 %v320_v47 }
  0x23   :  { %323 = vmatpush3.bf16.msra.mxu1 %v322_v50 }
  0xd8   :  { %v83_v54 = vpop.f32.mrb[0].mxu0 }
  0xd9   :  { %v290_v55 = vpop.f32.mrb[1].mxu0  ;;  %207 = vmatmul.mubr.f32.vlgmr.msra.gmra.mrb[0].mxu1 %v83_v54 }
  0xda   :  { %v86_v56 = vpop.f32.mrb[2].mxu0  ;;  %211 = vmatprep.mubr.f32.mxu1 %v245_v53 }
  0xdb   :  { %v291_v57 = vpop.f32.mrb[3].mxu0 }
  0xdd   :  { %212 = vmatmul.mubr.f32.gmra.mrb[2].mxu1 %v86_v56 }
 0x1ac   :  { %v280_v58 = vpop.f32.mrb[0].mxu1 }
 0x1ad   :  { %v281_v60 = vpop.f32.mrb[1].mxu1 }
 0x1ae   :  { %v282_v61 = vadd.f32 %v281_v60, %v280_v58 }
 0x1b0   :  { %v209_v62 = vadd.f32 %v282_v61, %v241_v59  ;;  %v283_v63 = vpop.f32.mrb[2].mxu1 }
 0x1b1   :  { %v284_v0 = vpop.f32.mrb[3].mxu1 }
 0x1b2   :  { %v217_v1 = vmax.f32 %v209_v62, 0.0  ;;  %v285_v2 = vadd.f32 %v284_v0, %v283_v63 }
 0x1b4   :  { %220 = vst.msk [vmem:[#allocation3] sm:$0xff] %vm219_vm2, %v217_v1  ;;  %v214_v3 = vadd.f32 %v285_v2, %v241_v59 }
 0x1b6   :  { %v218_v4 = vmax.f32 %v214_v3, 0.0 }
 0x1b8   :  { %221 = vst.msk [vmem:[#allocation3 + $0x8] sm:$0xff] %vm219_vm2, %v218_v4 }
 0x1b9   :  { %342 = shalt.err (!%p339_p4)
}
 0x1ba   :  { %s343_s11 = scalar_lea.hbm %s515_s5, 256 }
 0x1bb   :  { %p344_p5 = scmp.ne.s32.totalorder %s515_s5, %s343_s11  ;;  %p347_p6 = scmp.lt.u32.totalorder %s343_s11, %s515_s5 }
 0x1bd   :  { %p349_p7 = pnand %p347_p6, %p344_p5 }
 0x1bf   :  { %352 = shalt.err (!%p349_p7)
}
 0x1c0   :  { %s358_s16 = smov 128   ;;  %s359_s17 = smov 8  }
 0x1c1   :  { %233 = dma.vmem_to_hbm [thread:$0]  %s228_s8, 256, %s515_s5, [#allocation4], %s358_s16, %s358_s16, %s359_s17  }
 0x1c2   :  { %353 = dma.done.wait [#allocation4], 256  }
 0x1c3   :  { %354 = vsyncadd [#allocation4], 4294967040 }
 0x1c4   :  { %237 = vsyncpa [#allocation4], 1 }

</bundles_post_ra>
